<compile_context>
chip_gen: v5e
topology: v5e:2x2
jax: 0.10.0
libtpu: 0.0.40
codegen_flags: <defaults>
</compile_context>

<pallas_src>
import jax
import jax.numpy as jnp
from jax import lax
from jax.experimental import pallas as pl
from jax.experimental.pallas import tpu as pltpu

_EPS = 1e-8  # matches F.cosine_similarity eps (irrelevant for non-degenerate inputs)


# --------------------------------------------------------------------------
# generation-aware sizing helpers
# --------------------------------------------------------------------------

_GEN_CACHE = {}


def _tpu_gen_params():
    """Best-effort TPU-generation parameters (cached)."""
    if _GEN_CACHE:
        return _GEN_CACHE
    kind = ""
    try:
        kind = jax.devices()[0].device_kind.lower()
    except Exception:
        pass
    try:
        vmem_cap = int(pltpu.get_tpu_info().vmem_capacity_bytes)
    except Exception:
        vmem_cap = 64 * 1024 * 1024          # conservative (v7x-sized) fallback
    two_tc = ("v7" in kind) or ("7x" in kind)
    if two_tc:
        vmem_cap = min(vmem_cap, 64 * 1024 * 1024)   # per-TC VMEM on v7x
    mxu_n = 128 if any(t in kind for t in ("v2", "v3", "v4", "v5")) else 256
    big_vmem = vmem_cap >= 96 * 1024 * 1024          # v5e / v6e class (128 MiB)
    _GEN_CACHE.update(dict(
        mxu_n=mxu_n,
        row_target=768 if big_vmem else 256,          # packed rows per grid step
        budget=int(0.40 * vmem_cap),                  # working-set budget
        limit_cap=int(0.75 * vmem_cap),               # never request all of VMEM
        two_tc=two_tc,
    ))
    return _GEN_CACHE


def _rup(x, m):
    return -(-x // m) * m


def _vmem_bytes_estimate(gp, r, cf, cd, hid):
    """Per-step VMEM working set using (sublane, lane)-padded tile sizes."""
    cf_l, cd_l, hid_l = _rup(cf, 128), _rup(cd, 128), _rup(hid, 128)
    r_l = _rup(r, 128)
    r_s16, r_s8 = _rup(r, 16), _rup(r, 8)
    cf_s16, cd_s16, hid_s16 = _rup(cf, 16), _rup(cd, 16), _rup(hid, 16)
    cf_s8, cd_s8 = _rup(cf, 8), _rup(cd, 8)
    # bf16 input blocks (2 bytes), double-buffered by the pipeline
    inputs = 2 * 2 * gp * (r_s16 * cf_l + cf_s16 * r_l      # f1 rows, f2 cols
                           + r_s16 * cd_l + cd_s16 * r_l)   # d1 rows, d2 cols
    # predictor weights (bf16) + biases (f32), double-buffered
    weights = 2 * (2 * (cd_s16 * hid_l + hid_s16 * cd_l)
                   + 4 * (8 * hid_l + 8 * cd_l))
    # f32 temporaries; at most ~2 groups' live ranges overlap in the unrolled loop
    grp = 4 * (r_s8 * hid_l + 2 * r_s8 * cd_l                # hidden, pred(+bf16 copy)
               + (cf_s8 + cd_s8) * r_l                       # f32 casts for column norms
               + 6 * r_s8 * r_l)                             # sims, masks, iotas, onehot
    temps = grp * min(gp, 2)
    return inputs + weights + temps + 2 * 8 * 128 * 4


def _pick_blocks(b, S, cf, cd, hid, gen):
    """Pick (G images per packed MXU group, GP groups per grid step, n_steps)."""
    G = max(1, gen["mxu_n"] // S)              # G*S <= MXU width: no wasted N tiles
    if b >= 2:
        G = min(G, -(-b // 2))                 # keep >= 2 groups -> >= 2 grid steps
    G = max(1, min(G, b))
    while G > 1 and _vmem_bytes_estimate(1, G * S, cf, cd, hid) > gen["budget"]:
        G -= 1
    n_groups = -(-b // G)
    R = G * S

    GP = max(1, gen["row_target"] // R)        # generation-aware rows-per-step target
    if n_groups >= 2:
        GP = min(GP, -(-n_groups // 2))        # keep >= 2 grid steps
    GP = min(GP, n_groups)
    while GP > 1 and _vmem_bytes_estimate(GP, R, cf, cd, hid) > gen["budget"]:
        GP -= 1

    n_steps = -(-n_groups // GP)
    # v7x: both TensorCores run grid steps concurrently ("parallel" axis);
    # prefer an even step count if a slightly smaller GP gives one for free.
    if gen["two_tc"] and n_steps > 1 and n_steps % 2 == 1 and GP > 1:
        if (-(-n_groups // (GP - 1))) % 2 == 0:
            GP -= 1
            n_steps = -(-n_groups // GP)
    return G, GP, n_steps


# --------------------------------------------------------------------------
# kernel
# --------------------------------------------------------------------------

def _make_kernel(S, G, GP):
    R = G * S

    def kernel(f1_ref, f2t_ref, d1_ref, d2t_ref,
               w1_ref, b1_ref, w2_ref, b2_ref, out_ref):
        # resident predictor weights (hoisted out of the group loop)
        w1 = w1_ref[...]
        b1 = b1_ref[...]
        w2 = w2_ref[...]
        b2 = b2_ref[...]

        # column index (lane iota) for the first-occurrence argmax tie-break
        col_idx = lax.broadcasted_iota(jnp.int32, (R, R), 1)

        # block-diagonal (same-image) mask; division-free: floor((i+0.5)/S) is
        # exact in f32 for these ranges, pure VPU work, no relayout.
        if G > 1:
            row_idx = lax.broadcasted_iota(jnp.int32, (R, R), 0)
            inv_s = float(1.0 / S)
            row_img = jnp.floor((row_idx.astype(jnp.float32) + 0.5) * inv_s)
            col_img = jnp.floor((col_idx.astype(jnp.float32) + 0.5) * inv_s)
            same_img = row_img == col_img
        else:
            same_img = None
        neg_big = jnp.float32(-3.0e38)

        total = jnp.zeros((), jnp.float32)
        for g in range(GP):                      # GP is a small static constant
            f1 = f1_ref[g]                       # (R, CF) bf16 query rows (unnormalized:
            #                                      a per-row scale can't change the argmax)
            f2t = f2t_ref[g]                     # (CF, R) bf16 key columns
            d1 = d1_ref[g]                       # (R, CD) bf16
            d2t = d2t_ref[g]                     # (CD, R) bf16

            # ---- predictor: 1x1-conv MLP on packed rows (~MXU-width M) ----
            hid = jnp.dot(d1, w1, preferred_element_type=jnp.float32) + b1
            hid = jnp.maximum(hid, 0.0).astype(jnp.bfloat16)
            pred = jnp.dot(hid, w2, preferred_element_type=jnp.float32) + b2   # (R, CD) f32

            # l2-normalize prediction rows (rsqrt -> EUP slot)
            pssq = jnp.sum(pred * pred, axis=-1, keepdims=True)
            pred_n = (pred * lax.rsqrt(jnp.maximum(pssq, _EPS * _EPS))).astype(jnp.bfloat16)

            # per-column 1/||col|| scales for the two key tensors (f32)
            f2f = f2t.astype(jnp.float32)
            f2_scale = lax.rsqrt(jnp.maximum(
                jnp.sum(f2f * f2f, axis=0, keepdims=True), _EPS * _EPS))        # (1, R)
            d2f = d2t.astype(jnp.float32)
            d2_scale = lax.rsqrt(jnp.maximum(
                jnp.sum(d2f * d2f, axis=0, keepdims=True), _EPS * _EPS))        # (1, R)

            # ---- packed cross-image similarity matmuls (bf16 MXU, f32 acc) ----
            sim_feat = jnp.dot(f1, f2t, preferred_element_type=jnp.float32) * f2_scale
            sim_dense = jnp.dot(pred_n, d2t, preferred_element_type=jnp.float32) * d2_scale

            # ---- block-diagonal first-occurrence row argmax -> one-hot mask ----
            if same_img is not None:
                sim_feat_m = jnp.where(same_img, sim_feat, neg_big)
            else:
                sim_feat_m = sim_feat
            row_max = jnp.max(sim_feat_m, axis=-1, keepdims=True)
            first_idx = jnp.min(jnp.where(sim_feat_m == row_max, col_idx, R),
                                axis=-1, keepdims=True)
            onehot = (col_idx == first_idx).astype(jnp.float32)

            # gather-by-argmax + cosine_similarity + sum  ==  masked sum
            total = total + jnp.sum(sim_dense * onehot)

        out_ref[...] = jnp.broadcast_to(total, out_ref.shape)   # lane-dense store

    return kernel


# --------------------------------------------------------------------------
# wrapper
# --------------------------------------------------------------------------

@jax.jit
def densecl_head_forward(feat_on, feat_targ, dense_on, dense_targ,
                         w1, b1, w2, b2):
    """feat_*/dense_* are NCHW (PyTorch convention). Returns dict(loss=scalar)."""
    b, cf, h, w = feat_on.shape
    cd = dense_on.shape[1]
    hid = w1.shape[1]
    S = h * w

    gen = _tpu_gen_params()
    G, GP, n_steps = _pick_blocks(b, S, cf, cd, hid, gen)
    R = G * S
    b_pad = n_steps * GP * G          # zero-padded images contribute exactly 0

    def rows_layout(x):
        # NCHW -> packed query rows (n_steps*GP, G*S, C), bf16.  Single fused
        # transpose+cast pass over HBM in the wrapper; the leading-dim fold is
        # layout-preserving.
        c = x.shape[1]
        y = jnp.transpose(x.reshape(b, c, S).astype(jnp.bfloat16), (0, 2, 1))
        if b_pad > b:
            y = jnp.pad(y, ((0, b_pad - b), (0, 0), (0, 0)))
        return y.reshape(n_steps * GP, R, c)

    def cols_layout(x):
        # NCHW -> packed key columns (n_steps*GP, C, G*S), bf16: the contraction
        # dim (C) is already on sublanes, so the kernel needs no transposes.
        c = x.shape[1]
        y = x.reshape(b, c, S).astype(jnp.bfloat16)
        if b_pad > b:
            y = jnp.pad(y, ((0, b_pad - b), (0, 0), (0, 0)))
        y = y.reshape(n_steps * GP, G, c, S)
        y = jnp.transpose(y, (0, 2, 1, 3))
        return y.reshape(n_steps * GP, c, R)

    f1 = rows_layout(feat_on)          # .detach() is a no-op for a pure forward
    f2t = cols_layout(feat_targ)
    d1 = rows_layout(dense_on)
    d2t = cols_layout(dense_targ)

    w1_b = w1.astype(jnp.bfloat16)
    w2_b = w2.astype(jnp.bfloat16)
    b1_2d = b1.reshape(1, hid).astype(jnp.float32)
    b2_2d = b2.reshape(1, cd).astype(jnp.float32)

    est = _vmem_bytes_estimate(GP, R, cf, cd, hid)
    vmem_limit = int(min(gen["limit_cap"], max(32 * 1024 * 1024, 2 * est)))

    kernel = _make_kernel(S, G, GP)

    partial = pl.pallas_call(
        kernel,
        out_shape=jax.ShapeDtypeStruct((n_steps, 8, 128), jnp.float32),
        grid_spec=pltpu.PrefetchScalarGridSpec(
            num_scalar_prefetch=0,
            grid=(n_steps,),
            in_specs=[
                pl.BlockSpec((GP, R, cf), lambda i: (i, 0, 0)),   # feat_on rows
                pl.BlockSpec((GP, cf, R), lambda i: (i, 0, 0)),   # feat_targ cols
                pl.BlockSpec((GP, R, cd), lambda i: (i, 0, 0)),   # dense_on rows
                pl.BlockSpec((GP, cd, R), lambda i: (i, 0, 0)),   # dense_targ cols
                pl.BlockSpec((cd, hid), lambda i: (0, 0)),        # W1 (resident)
                pl.BlockSpec((1, hid), lambda i: (0, 0)),         # b1
                pl.BlockSpec((hid, cd), lambda i: (0, 0)),        # W2 (resident)
                pl.BlockSpec((1, cd), lambda i: (0, 0)),          # b2
            ],
            out_specs=pl.BlockSpec((1, 8, 128), lambda i: (i, 0, 0)),
        ),
        compiler_params=pltpu.CompilerParams(
            dimension_semantics=("parallel",),    # no cross-step carry
            vmem_limit_bytes=vmem_limit),
    )(f1, f2t, d1, d2t, w1_b, b1_2d, w2_b, b2_2d)

    cos_sim = jnp.sum(partial[:, 0, 0])
    loss = -2.0 * cos_sim / (b * h * w) + 2.0      # size_average=True, loss_bias=2
    return dict(loss=loss)


# --------------------------------------------------------------------------
# pure-JAX reference (mirrors the PyTorch forward, f32 compute, same
# bf16-rounded inputs/weights the kernel consumes)
# --------------------------------------------------------------------------

def _reference_forward(feat_on, feat_targ, dense_on, dense_targ, w1, b1, w2, b2):
    b, cf, h, w = feat_on.shape
    S = h * w

    def to_bsc(x):
        y = jnp.transpose(x.reshape(x.shape[0], x.shape[1], S), (0, 2, 1))
        return y.astype(jnp.bfloat16).astype(jnp.float32)

    f1, f2 = to_bsc(feat_on), to_bsc(feat_targ)
    d1, d2 = to_bsc(dense_on), to_bsc(dense_targ)
    w1f = w1.astype(jnp.bfloat16).astype(jnp.float32)
    w2f = w2.astype(jnp.bfloat16).astype(jnp.float32)

    hp = lax.Precision.HIGHEST
    pred = jnp.maximum(jnp.einsum('bsc,ch->bsh', d1, w1f, precision=hp) + b1, 0.0)
    pred = jnp.einsum('bsh,hc->bsc', pred, w2f, precision=hp) + b2

    def nrm(x):
        ssq = jnp.sum(x * x, axis=-1, keepdims=True)
        return x * lax.rsqrt(jnp.maximum(ssq, _EPS * _EPS))

    sim_feat = jnp.einsum('bqc,bkc->bqk', nrm(f1), nrm(f2), precision=hp)
    sim_dense = jnp.einsum('bqc,bkc->bqk', nrm(pred), nrm(d2), precision=hp)
    idx = jnp.argmax(sim_feat, axis=-1)
    sel = jnp.take_along_axis(sim_dense, idx[..., None], axis=-1)[..., 0]
    cos = sel.sum()
    return -2.0 * cos / (b * h * w) + 2.0


if __name__ == "__main__":
    key = jax.random.PRNGKey(0)
    # small shapes; S = H*W = 16.  B=3 exercises cross-image packing (G=2),
    # a multi-step grid and batch zero-padding.
    B, CF, CD, HID, H, W = 3, 4, 8, 32, 4, 4

    k = jax.random.split(key, 8)
    feat_on    = jax.random.normal(k[0], (B, CF, H, W), jnp.float32)
    feat_targ  = jax.random.normal(k[1], (B, CF, H, W), jnp.float32)
    dense_on   = jax.random.normal(k[2], (B, CD, H, W), jnp.float32)   # feats_on['dense_proj']
    dense_targ = jax.random.normal(k[3], (B, CD, H, W), jnp.float32)   # feats_targ['dense_proj']

    # deterministic predictor params (1x1 conv MLP: CD -> HID -> CD)
    w1 = jax.random.normal(k[4], (CD, HID), jnp.float32) * 0.05
    b1 = jax.random.normal(k[5], (HID,), jnp.float32) * 0.01
    w2 = jax.random.normal(k[6], (HID, CD), jnp.float32) * 0.05
    b2 = jax.random.normal(k[7], (CD,), jnp.float32) * 0.01

    out = densecl_head_forward(feat_on, feat_targ, dense_on, dense_targ,
                               w1, b1, w2, b2)
    loss = jax.block_until_ready(out["loss"])

    ref = _reference_forward(feat_on, feat_targ, dense_on, dense_targ,
                             w1, b1, w2, b2)
    assert bool(jnp.isfinite(loss)), loss
    # bf16 inputs / bf16 MXU operands with f32 accumulation -> loosened tolerance.
    assert jnp.allclose(loss, ref, atol=3e-2, rtol=3e-2), (loss, ref)

    print("KERNEL_OK")
</pallas_src>

<mosaic_0001>
module attributes {stable_mosaic.version = 11 : i64} {
  func.func @kernel(%arg0: i32, %arg1: memref<1x32x4xbf16, #tpu.memory_space<vmem>>, %arg2: memref<1x4x32xbf16, #tpu.memory_space<vmem>>, %arg3: memref<1x32x8xbf16, #tpu.memory_space<vmem>>, %arg4: memref<1x8x32xbf16, #tpu.memory_space<vmem>>, %arg5: memref<8x32xbf16, #tpu.memory_space<vmem>>, %arg6: memref<1x32xf32, #tpu.memory_space<vmem>>, %arg7: memref<32x8xbf16, #tpu.memory_space<vmem>>, %arg8: memref<1x8xf32, #tpu.memory_space<vmem>>, %arg9: memref<1x8x128xf32, #tpu.memory_space<vmem>>) attributes {dimension_semantics = [#tpu.dimension_semantics<parallel>], iteration_bounds = array<i64: 2>, scalar_prefetch = 0 : i64, scratch_operands = 0 : i64, tpu.core_type = #tpu.core_type<tc>, window_params = [{transform_indices = @transform_0, window_bounds = array<i64: 1, 32, 4>}, {transform_indices = @transform_1, window_bounds = array<i64: 1, 4, 32>}, {transform_indices = @transform_2, window_bounds = array<i64: 1, 32, 8>}, {transform_indices = @transform_3, window_bounds = array<i64: 1, 8, 32>}, {pipeline_mode = #tpu.pipeline_mode<synchronous>, transform_indices = @transform_4, window_bounds = array<i64: 8, 32>}, {pipeline_mode = #tpu.pipeline_mode<synchronous>, transform_indices = @transform_5, window_bounds = array<i64: 1, 32>}, {pipeline_mode = #tpu.pipeline_mode<synchronous>, transform_indices = @transform_6, window_bounds = array<i64: 32, 8>}, {pipeline_mode = #tpu.pipeline_mode<synchronous>, transform_indices = @transform_7, window_bounds = array<i64: 1, 8>}, {transform_indices = @transform_8, window_bounds = array<i64: 1, 8, 128>}]} {
    %c0 = arith.constant 0 : index
    %c0_0 = arith.constant 0 : index
    %0 = vector.load %arg5[%c0, %c0_0] : memref<8x32xbf16, #tpu.memory_space<vmem>>, vector<8x32xbf16>
    %c0_1 = arith.constant 0 : index
    %c0_2 = arith.constant 0 : index
    %1 = vector.load %arg6[%c0_1, %c0_2] : memref<1x32xf32, #tpu.memory_space<vmem>>, vector<1x32xf32>
    %c0_3 = arith.constant 0 : index
    %c0_4 = arith.constant 0 : index
    %2 = vector.load %arg7[%c0_3, %c0_4] : memref<32x8xbf16, #tpu.memory_space<vmem>>, vector<32x8xbf16>
    %c0_5 = arith.constant 0 : index
    %c0_6 = arith.constant 0 : index
    %3 = vector.load %arg8[%c0_5, %c0_6] : memref<1x8xf32, #tpu.memory_space<vmem>>, vector<1x8xf32>
    %4 = tpu.iota {dimensions = array<i32: 1>} : vector<32x32xi32>
    %5 = tpu.iota {dimensions = array<i32: 0>} : vector<32x32xi32>
    %6 = arith.sitofp %5 : vector<32x32xi32> to vector<32x32xf32>
    %cst = arith.constant 5.000000e-01 : f32
    %7 = vector.broadcast %cst : f32 to vector<32x32xf32>
    %8 = arith.addf %6, %7 : vector<32x32xf32>
    %cst_7 = arith.constant 6.250000e-02 : f32
    %9 = vector.broadcast %cst_7 : f32 to vector<32x32xf32>
    %10 = arith.mulf %8, %9 : vector<32x32xf32>
    %11 = math.floor %10 : vector<32x32xf32>
    %12 = arith.sitofp %4 : vector<32x32xi32> to vector<32x32xf32>
    %cst_8 = arith.constant 5.000000e-01 : f32
    %13 = vector.broadcast %cst_8 : f32 to vector<32x32xf32>
    %14 = arith.addf %12, %13 : vector<32x32xf32>
    %cst_9 = arith.constant 6.250000e-02 : f32
    %15 = vector.broadcast %cst_9 : f32 to vector<32x32xf32>
    %16 = arith.mulf %14, %15 : vector<32x32xf32>
    %17 = math.floor %16 : vector<32x32xf32>
    %18 = arith.cmpf oeq, %11, %17 : vector<32x32xf32>
    %c0_10 = arith.constant 0 : index
    %c0_11 = arith.constant 0 : index
    %c0_12 = arith.constant 0 : index
    %19 = vector.load %arg1[%c0_10, %c0_11, %c0_12] : memref<1x32x4xbf16, #tpu.memory_space<vmem>>, vector<1x32x4xbf16>
    %20 = vector.shape_cast %19 : vector<1x32x4xbf16> to vector<32x4xbf16>
    %c0_13 = arith.constant 0 : index
    %c0_14 = arith.constant 0 : index
    %c0_15 = arith.constant 0 : index
    %21 = vector.load %arg2[%c0_13, %c0_14, %c0_15] : memref<1x4x32xbf16, #tpu.memory_space<vmem>>, vector<1x4x32xbf16>
    %22 = vector.shape_cast %21 : vector<1x4x32xbf16> to vector<4x32xbf16>
    %c0_16 = arith.constant 0 : index
    %c0_17 = arith.constant 0 : index
    %c0_18 = arith.constant 0 : index
    %23 = vector.load %arg3[%c0_16, %c0_17, %c0_18] : memref<1x32x8xbf16, #tpu.memory_space<vmem>>, vector<1x32x8xbf16>
    %24 = vector.shape_cast %23 : vector<1x32x8xbf16> to vector<32x8xbf16>
    %c0_19 = arith.constant 0 : index
    %c0_20 = arith.constant 0 : index
    %c0_21 = arith.constant 0 : index
    %25 = vector.load %arg4[%c0_19, %c0_20, %c0_21] : memref<1x8x32xbf16, #tpu.memory_space<vmem>>, vector<1x8x32xbf16>
    %26 = vector.shape_cast %25 : vector<1x8x32xbf16> to vector<8x32xbf16>
    %cst_22 = arith.constant dense<0.000000e+00> : vector<32x32xf32>
    %27 = tpu.matmul %24, %0, %cst_22 {dimension_numbers = #tpu.dot_dimension_numbers<[1], [0], [0], [1], [0, 0, 1, 1], [], []>} : vector<32x8xbf16>, vector<8x32xbf16>, vector<32x32xf32> -> vector<32x32xf32>
    %28 = vector.broadcast %1 : vector<1x32xf32> to vector<32x32xf32>
    %29 = arith.addf %27, %28 : vector<32x32xf32>
    %cst_23 = arith.constant 0.000000e+00 : f32
    %30 = vector.broadcast %cst_23 : f32 to vector<32x32xf32>
    %31 = arith.maximumf %29, %30 : vector<32x32xf32>
    %32 = arith.truncf %31 : vector<32x32xf32> to vector<32x32xbf16>
    %cst_24 = arith.constant dense<0.000000e+00> : vector<32x8xf32>
    %33 = tpu.matmul %32, %2, %cst_24 {dimension_numbers = #tpu.dot_dimension_numbers<[1], [0], [0], [1], [0, 0, 1, 1], [], []>} : vector<32x32xbf16>, vector<32x8xbf16>, vector<32x8xf32> -> vector<32x8xf32>
    %34 = vector.broadcast %3 : vector<1x8xf32> to vector<32x8xf32>
    %35 = arith.addf %33, %34 : vector<32x8xf32>
    %36 = arith.mulf %35, %35 : vector<32x8xf32>
    %cst_25 = arith.constant dense<0.000000e+00> : vector<32xf32>
    %37 = vector.multi_reduction <add>, %36, %cst_25 [1] : vector<32x8xf32> to vector<32xf32>
    %38 = vector.shape_cast %37 : vector<32xf32> to vector<32x1xf32>
    %cst_26 = arith.constant 1.000000e-16 : f32
    %39 = vector.broadcast %cst_26 : f32 to vector<32x1xf32>
    %40 = arith.maximumf %38, %39 : vector<32x1xf32>
    %41 = math.rsqrt %40 : vector<32x1xf32>
    %42 = vector.broadcast %41 : vector<32x1xf32> to vector<32x8xf32>
    %43 = arith.mulf %35, %42 : vector<32x8xf32>
    %44 = arith.truncf %43 : vector<32x8xf32> to vector<32x8xbf16>
    %45 = arith.extf %22 : vector<4x32xbf16> to vector<4x32xf32>
    %46 = arith.mulf %45, %45 : vector<4x32xf32>
    %cst_27 = arith.constant dense<0.000000e+00> : vector<32xf32>
    %47 = vector.multi_reduction <add>, %46, %cst_27 [0] : vector<4x32xf32> to vector<32xf32>
    %48 = vector.shape_cast %47 : vector<32xf32> to vector<1x32xf32>
    %cst_28 = arith.constant 1.000000e-16 : f32
    %49 = vector.broadcast %cst_28 : f32 to vector<1x32xf32>
    %50 = arith.maximumf %48, %49 : vector<1x32xf32>
    %51 = math.rsqrt %50 : vector<1x32xf32>
    %52 = arith.extf %26 : vector<8x32xbf16> to vector<8x32xf32>
    %53 = arith.mulf %52, %52 : vector<8x32xf32>
    %cst_29 = arith.constant dense<0.000000e+00> : vector<32xf32>
    %54 = vector.multi_reduction <add>, %53, %cst_29 [0] : vector<8x32xf32> to vector<32xf32>
    %55 = vector.shape_cast %54 : vector<32xf32> to vector<1x32xf32>
    %cst_30 = arith.constant 1.000000e-16 : f32
    %56 = vector.broadcast %cst_30 : f32 to vector<1x32xf32>
    %57 = arith.maximumf %55, %56 : vector<1x32xf32>
    %58 = math.rsqrt %57 : vector<1x32xf32>
    %cst_31 = arith.constant dense<0.000000e+00> : vector<32x32xf32>
    %59 = tpu.matmul %20, %22, %cst_31 {dimension_numbers = #tpu.dot_dimension_numbers<[1], [0], [0], [1], [0, 0, 1, 1], [], []>} : vector<32x4xbf16>, vector<4x32xbf16>, vector<32x32xf32> -> vector<32x32xf32>
    %60 = vector.broadcast %51 : vector<1x32xf32> to vector<32x32xf32>
    %61 = arith.mulf %59, %60 : vector<32x32xf32>
    %cst_32 = arith.constant dense<0.000000e+00> : vector<32x32xf32>
    %62 = tpu.matmul %44, %26, %cst_32 {dimension_numbers = #tpu.dot_dimension_numbers<[1], [0], [0], [1], [0, 0, 1, 1], [], []>} : vector<32x8xbf16>, vector<8x32xbf16>, vector<32x32xf32> -> vector<32x32xf32>
    %63 = vector.broadcast %58 : vector<1x32xf32> to vector<32x32xf32>
    %64 = arith.mulf %62, %63 : vector<32x32xf32>
    %cst_33 = arith.constant -3.000000e+38 : f32
    %65 = vector.broadcast %cst_33 : f32 to vector<32x32xf32>
    %66 = arith.select %18, %61, %65 : vector<32x32xi1>, vector<32x32xf32>
    %cst_34 = arith.constant dense<0xFF800000> : vector<32xf32>
    %67 = vector.multi_reduction <maximumf>, %66, %cst_34 [1] : vector<32x32xf32> to vector<32xf32>
    %68 = vector.shape_cast %67 : vector<32xf32> to vector<32x1xf32>
    %69 = vector.broadcast %68 : vector<32x1xf32> to vector<32x32xf32>
    %70 = arith.cmpf oeq, %66, %69 : vector<32x32xf32>
    %c32_i32 = arith.constant 32 : i32
    %71 = vector.broadcast %c32_i32 : i32 to vector<32x32xi32>
    %72 = arith.select %70, %4, %71 : vector<32x32xi1>, vector<32x32xi32>
    %cst_35 = arith.constant dense<2147483647> : vector<32xi32>
    %73 = vector.multi_reduction <minsi>, %72, %cst_35 [1] : vector<32x32xi32> to vector<32xi32>
    %74 = vector.shape_cast %73 : vector<32xi32> to vector<32x1xi32>
    %75 = vector.broadcast %74 : vector<32x1xi32> to vector<32x32xi32>
    %76 = arith.cmpi eq, %4, %75 : vector<32x32xi32>
    %77 = arith.extui %76 : vector<32x32xi1> to vector<32x32xi32>
    %78 = arith.sitofp %77 : vector<32x32xi32> to vector<32x32xf32>
    %79 = arith.mulf %64, %78 : vector<32x32xf32>
    %80 = vector.shape_cast %79 : vector<32x32xf32> to vector<1x32x32xf32>
    %cst_36 = arith.constant dense<0.000000e+00> : vector<1xf32>
    %81 = vector.multi_reduction <add>, %80, %cst_36 [1, 2] : vector<1x32x32xf32> to vector<1xf32>
    %82 = vector.shape_cast %81 : vector<1xf32> to vector<1x1x1xf32>
    %83 = vector.extract %82[0, 0, 0] : f32 from vector<1x1x1xf32>
    %cst_37 = arith.constant 0.000000e+00 : f32
    %84 = arith.addf %cst_37, %83 : f32
    %85 = vector.broadcast %84 : f32 to vector<1x8x128xf32>
    %c0_38 = arith.constant 0 : index
    %c0_39 = arith.constant 0 : index
    %c0_40 = arith.constant 0 : index
    %86 = vector.load %arg9[%c0_38, %c0_39, %c0_40] : memref<1x8x128xf32, #tpu.memory_space<vmem>>, vector<1x8x128xf32>
    tpu.vector_store %arg9[%c0_38, %c0_39, %c0_40], %85 {strides = array<i32>} : memref<1x8x128xf32, #tpu.memory_space<vmem>>, vector<1x8x128xf32>,
    return
  }
  func.func @transform_0(%arg0: i32) -> (i32, i32, i32) {
    %c0_i32 = arith.constant 0 : i32
    %c0_i32_0 = arith.constant 0 : i32
    %c0_i32_1 = arith.constant 0 : i32
    return %arg0, %c0_i32, %c0_i32_0 : i32, i32, i32
  }
  func.func @transform_1(%arg0: i32) -> (i32, i32, i32) {
    %c0_i32 = arith.constant 0 : i32
    %c0_i32_0 = arith.constant 0 : i32
    %c0_i32_1 = arith.constant 0 : i32
    return %arg0, %c0_i32, %c0_i32_0 : i32, i32, i32
  }
  func.func @transform_2(%arg0: i32) -> (i32, i32, i32) {
    %c0_i32 = arith.constant 0 : i32
    %c0_i32_0 = arith.constant 0 : i32
    %c0_i32_1 = arith.constant 0 : i32
    return %arg0, %c0_i32, %c0_i32_0 : i32, i32, i32
  }
  func.func @transform_3(%arg0: i32) -> (i32, i32, i32) {
    %c0_i32 = arith.constant 0 : i32
    %c0_i32_0 = arith.constant 0 : i32
    %c0_i32_1 = arith.constant 0 : i32
    return %arg0, %c0_i32, %c0_i32_0 : i32, i32, i32
  }
  func.func @transform_4(%arg0: i32) -> (i32, i32) {
    %c0_i32 = arith.constant 0 : i32
    %c0_i32_0 = arith.constant 0 : i32
    %c0_i32_1 = arith.constant 0 : i32
    return %c0_i32, %c0_i32_0 : i32, i32
  }
  func.func @transform_5(%arg0: i32) -> (i32, i32) {
    %c0_i32 = arith.constant 0 : i32
    %c0_i32_0 = arith.constant 0 : i32
    %c0_i32_1 = arith.constant 0 : i32
    return %c0_i32, %c0_i32_0 : i32, i32
  }
  func.func @transform_6(%arg0: i32) -> (i32, i32) {
    %c0_i32 = arith.constant 0 : i32
    %c0_i32_0 = arith.constant 0 : i32
    %c0_i32_1 = arith.constant 0 : i32
    return %c0_i32, %c0_i32_0 : i32, i32
  }
  func.func @transform_7(%arg0: i32) -> (i32, i32) {
    %c0_i32 = arith.constant 0 : i32
    %c0_i32_0 = arith.constant 0 : i32
    %c0_i32_1 = arith.constant 0 : i32
    return %c0_i32, %c0_i32_0 : i32, i32
  }
  func.func @transform_8(%arg0: i32) -> (i32, i32, i32) {
    %c0_i32 = arith.constant 0 : i32
    %c0_i32_0 = arith.constant 0 : i32
    %c0_i32_1 = arith.constant 0 : i32
    return %arg0, %c0_i32, %c0_i32_0 : i32, i32, i32
  }
}

</mosaic_0001>

<bundles_post_ra>
// kernel: densecl_head_forward.1
= control target key start
LH: loop header
LB: loop body
LE: loop exit
PB: predicated region body
PF: predicated region fallthrough
CT: control target
= control target key end

     0   :  { %s1025_s27 = smov 0   ;;  %s1184_s0 = inlined_call_operand.vmem [shape: bf16[2,32,4], index: 0, kind: input, shape index: {}]   ;;  %s1185_s1 = inlined_call_operand.vmem [shape: bf16[2,4,32], index: 1, kind: input, shape index: {}]   ;;  %s1186_s2 = inlined_call_operand.vmem [shape: bf16[2,32,8], index: 2, kind: input, shape index: {}]   ;;  %s1187_s3 = inlined_call_operand.vmem [shape: bf16[2,8,32], index: 3, kind: input, shape index: {}]   ;;  %s1188_s4 = inlined_call_operand.vmem [shape: bf16[8,32], index: 4, kind: input, shape index: {}]   ;;  %s1189_s5 = inlined_call_operand.vmem [shape: f32[1,32], index: 5, kind: input, shape index: {}]   ;;  %s1190_s6 = inlined_call_operand.vmem [shape: bf16[32,8], index: 6, kind: input, shape index: {}]   ;;  %s1191_s7 = inlined_call_operand.vmem [shape: f32[1,8], index: 7, kind: input, shape index: {}]   ;;  %s1192_s8 = inlined_call_operand.vmem [shape: f32[2,8,128], index: 8, kind: output, shape index: {}]  }
   0x1 LB: > { %s888_s28 = sadd.s32 4294967295, %s977_s27   ;;  %p892_p0 = scmp.ge.s32.totalorder %s977_s27, 1  ;;  %s977_s27 = sphi %s1025_s27, %s18_s27  }
   0x2   : > { %p290_p1 = scmp.lt.s32.totalorder %s977_s27, 3 }
   0x4   : > { %p291_p2 = pnand %p892_p0, %p290_p1 }
   0x5   : > { %p336_p3 = scmp.lt.s32.totalorder (!%p291_p2), %s888_s28, 1 }
   0x6   : > { %294 = sbr.rel (%p291_p2) target bundleno = 867 (0x363), region = 52 }
   0xb   : > { %v359_v0 = vld [vmem:[%s1188_s4] sm:$0xf]  ;;  %vm427_vm0 = vcmask 1043456   ;;  %s1194_s28 = smov (!%p336_p3, %s888_s28), 1  ;;  %vm621_vm1 = vcmask 1041408   ;;  %vm420_vm2 = vcmask 64512   ;;  %v366_v20 = vlaneseq }
   0xc   : > { %v429_v1 = vsel %vm427_vm0, %v359_v0, 0  ;;  %s895_s9 = sshll.u32 %s1194_s28, 1  ;;  %s938_s10 = sshll.u32 %s1194_s28, 4  ;;  %vm614_vm3 = vcmask 31744   ;;  %vm565_vm4 = vcmask 257024   ;;  %v941_v17 = vld [vmem:[%s1190_s6 + $0x8] sm:$0xff] }
   0xd   : > { %438 = vmatpush.bf16.msra.mxu0 %v429_v1  ;;  %s344_s13 = scalar_lea.vmem %s1185_s1, %s895_s9  ;;  %s349_s16 = scalar_lea.vmem %s1186_s2, %s938_s10  ;;  %484 = vmatpush.bf16.msra.mxu1 %v941_v17  ;;  %v940_v18 = vld [vmem:[%s1190_s6] sm:$0xff]  ;;  %v1062_v22 = vand.u32 127, %v366_v20  ;;  %v1064_v23 = vshrl.u32 %v366_v20, 7  ;;  %vm471_vm9 = vcmask 261120  }
   0xe   : > { %v401_v2 = vld [vmem:[%s344_s13] sm:$0x3]  ;;  %s1050_s19 = scalar_lea.vmem %s1184_s0, %s938_s10  ;;  %v945_v6 = vld [vmem:[%s349_s16 + $0x8] sm:$0xff]  ;;  %s898_s30 = sshll.u32 %s1194_s28, 2 }
   0xf   : > { %v944_v3 = vld [vmem:[%s349_s16] sm:$0xff]  ;;  %v623_v4 = vsel %vm621_vm1, %v401_v2, 0  ;;  %v563_v7 = vunpack.c.l.bf16 %v401_v2  ;;  %v943_v25 = vld [vmem:[%s1050_s19 + $0x8] sm:$0xff]  ;;  %v373_v26 = vcvt.s32.f32 %v1064_v23  ;;  %v389_v27 = vcvt.s32.f32 %v1062_v22  ;;  %s353_s11 = scalar_lea.vmem %s1187_s3, %s898_s30  ;;  %s899_s12 = sshll.u32 %s1194_s28, 3 }
  0x10   : > { %v942_v5 = vld [vmem:[%s1050_s19] sm:$0xff]  ;;  %632 = vmatpush.bf16.msra.mxu2 %v623_v4  ;;  %908 = vmatmul.msk.bf16.vlgmr.msra.gmra.mxu0 %vm420_vm2, %v944_v3  ;;  %v370_v31 = vadd.s32 8, %v1064_v23  ;;  %s357_s15 = scalar_lea.vmem %s1192_s8, %s899_s12 }
  0x11   : > { %v564_v8 = vmul.f32 %v563_v7, %v563_v7  ;;  %485 = vmatpush.bf16.msra.mxu1 %v940_v18  ;;  %v377_v29 = vadd.f32 0.5, %v373_v26  ;;  %v390_v30 = vadd.f32 0.5, %v389_v27  ;;  %v957_v37 = vld [vmem:[%s1189_s5] ss:$0 sm:$0xff] }
  0x12   : > { %v374_v36 = vcvt.s32.f32 %v370_v31 }
  0x13   : > { %928 = vmatmul.msk.bf16.vlgmr.msra.gmra.mxu2 %vm614_vm3, %v942_v5  ;;  %v566_v9 = vsel %vm565_vm4, %v564_v8, 0.0  ;;  %v381_v34 = vmul.f32 0.0625, %v377_v29  ;;  %v391_v35 = vmul.f32 0.0625, %v390_v30  ;;  %v958_v8 = vld [vmem:[%s1191_s7] ss:$0 sm:$0xff] }
  0x14   : > { %v567_v10 = vrot.slane %v566_v9, 4  ;;  %v378_v41 = vadd.f32 0.5, %v374_v36 }
  0x15   : > { %v385_v39 = vfloor.f32 %v381_v34  ;;  %v1074_v40 = vfloor.f32 %v391_v35 }
  0x16   : > { %v568_v11 = vadd.f32 %v567_v10, %v566_v9  ;;  %v382_v47 = vmul.f32 0.0625, %v378_v41 }
  0x17   : > { %vm393_vm8 = vcmp.eq.f32.partialorder %v385_v39, %v1074_v40 }
  0x18   : > { %v569_v12 = vrot.slane %v568_v11, 2  ;;  %v386_v54 = vfloor.f32 %v382_v47 }
  0x1a   : > { %v570_v13 = vadd.f32 %v569_v12, %v568_v11  ;;  %vm394_vm10 = vcmp.eq.f32.partialorder %v386_v54, %v1074_v40 }
  0x1c   : > { %v571_v14 = vrot.slane %v570_v13, 1 }
  0x1e   : > { %v572_v15 = vadd.f32 %v571_v14, %v570_v13 }
  0x20   : > { %909 = vmatmul.msk.bf16.gmra.mxu0 %vm420_vm2, %v945_v6  ;;  %v573_v16 = vmax.f32 %v572_v15, 1e-16  ;;  %v371_v6 = vadd.s32 16, %v1064_v23 }
  0x22   : > { %959 = vrsqrt.f32 %v573_v16  ;;  %vm580_vm5 = vweird.f32 %v573_v16  ;;  %v375_v9 = vcvt.s32.f32 %v371_v6 }
  0x23   : > { %929 = vmatmul.msk.bf16.gmra.mxu2 %vm614_vm3, %v943_v25 }
  0x24   : > { %v379_v12 = vadd.f32 0.5, %v375_v9 }
  0x26   : > { %v383_v15 = vmul.f32 0.0625, %v379_v12 }
  0x28   : > { %v960_v19 = vpop.eup %959 }
  0x29   : > { %v575_v21 = vmul.f32 %v960_v19, %v573_v16  ;;  %vm581_vm6 = vweird.f32 %v960_v19 }
  0x2a   : > { %vm582_vm7 = vmor %vm580_vm5, %vm581_vm6 }
  0x2b   : > { %v576_v24 = vmul.f32 %v960_v19, %v575_v21  ;;  %v372_v21 = vadd.s32 24, %v1064_v23 }
  0x2d   : > { %v577_v28 = vmul.f32 0.5, %v576_v24  ;;  %v376_v27 = vcvt.s32.f32 %v372_v21 }
  0x2f   : > { %v578_v32 = vsub.f32 1.5, %v577_v28 }
  0x31   : > { %v579_v38 = vmul.f32 %v960_v19, %v578_v32 }
  0x33   : > { %v1076_v43 = vsel %vm582_vm7, %v960_v19, %v579_v38  ;;  %v387_v19 = vfloor.f32 %v383_v15 }
  0x35   : > { %vm395_vm12 = vcmp.eq.f32.partialorder %v387_v19, %v1074_v40 }
  0x8d   : > { %v440_v33 = vpop.f32.mrf.mxu0 }
  0x8e   : > { %v441_v42 = vadd.f32 %v957_v37, %v440_v33  ;;  %v380_v33 = vadd.f32 0.5, %v376_v27 }
  0x90   : > { %v450_v49 = vmax.f32 %v441_v42, 0.0  ;;  %v384_v36 = vmul.f32 0.0625, %v380_v33 }
  0x95   : > { %v442_v44 = vpop.f32.mrf.mxu0 }
  0x96   : > { %v443_v45 = vadd.f32 %v957_v37, %v442_v44  ;;  %v634_v46 = vpop.f32.mrf.mxu2  ;;  %v388_v44 = vfloor.f32 %v384_v36 }
  0x97   : > { %v644_v48 = vmul.f32 %v634_v46, %v1076_v43 }
  0x98   : > { %v451_v50 = vmax.f32 %v443_v45, 0.0  ;;  %vm396_vm14 = vcmp.eq.f32.partialorder %v388_v44, %v1074_v40  ;;  %v1137_v40 = vld [vmem:[%s353_s11] sm:$0xf] }
  0x99   : > { %v680_v51 = vsel %vm393_vm8, %v644_v48, -3e+38 }
  0x9a   : > { %v454_v52 = vpack.c.bf16 %v451_v50, %v450_v49  ;;  %v684_v53 = vsel %vm471_vm9, %v680_v51, -inf }
  0x9b   : > { %685 = vmax.xlane.f32.xlu2 %v684_v53 }
  0x9c   : > { %918 = vmatmul.msk.bf16.vlgmr.msra.gmra.mxu1 %vm471_vm9, %v454_v52 }
  0x9d   : > { %v445_v55 = vpop.f32.mrf.mxu0 }
  0x9e   : > { %v636_v56 = vpop.f32.mrf.mxu2  ;;  %v446_v60 = vadd.f32 %v957_v37, %v445_v55 }
  0x9f   : > { %v645_v57 = vmul.f32 %v636_v56, %v1076_v43 }
  0xa0   : > { %v452_v63 = vmax.f32 %v446_v60, 0.0 }
  0xa1   : > { %v681_v58 = vsel %vm394_vm10, %v645_v57, -3e+38 }
  0xa2   : > { %v687_v59 = vsel %vm471_vm9, %v681_v58, -inf }
  0xa3   : > { %688 = vmax.xlane.f32.xlu2 %v687_v59 }
  0xa5   : > { %v447_v61 = vpop.f32.mrf.mxu0 }
  0xa6   : > { %v448_v62 = vadd.f32 %v957_v37, %v447_v61  ;;  %v639_v18 = vpop.f32.mrf.mxu2 }
  0xa7   : > { %v646_v25 = vmul.f32 %v639_v18, %v1076_v43 }
  0xa8   : > { %v453_v0 = vmax.f32 %v448_v62, 0.0 }
  0xa9   : > { %v682_v29 = vsel %vm395_vm12, %v646_v25, -3e+38 }
  0xaa   : > { %v455_v1 = vpack.c.bf16 %v453_v0, %v452_v63  ;;  %v690_v23 = vsel %vm471_vm9, %v682_v29, -inf }
  0xac   : > { %919 = vmatmul.msk.bf16.gmra.mxu1 %vm471_vm9, %v455_v1 }
  0xae   : > { %v641_v41 = vpop.f32.mrf.mxu2 }
  0xaf   : > { %v647_v47 = vmul.f32 %v641_v41, %v1076_v43  ;;  %v655_v43 = vsel %vm427_vm0, %v1137_v40, 0 }
  0xb0   : > { %664 = vmatpush.bf16.msra.mxu3 %v655_v43 }
  0xb1   : > { %v1126_v48 = vsel %vm396_vm14, %v647_v47, -3e+38 }
  0xb2   : > { %v693_v49 = vsel %vm471_vm9, %v1126_v48, -inf }
 0x10e   : > { %v686_v2 = vpop.xlane.xlu2 %685 }
 0x10f   : > { %vm696_vm11 = vcmp.eq.f32.partialorder %v680_v51, %v686_v2 }
 0x110   : > { %v700_v3 = vsel %vm696_vm11, %v1062_v22, 32 }
 0x111   : > { %v704_v4 = vsel %vm471_vm9, %v700_v3, 2147483647 }
 0x112   : > { %v706_v5 = vshra.s32 %v704_v4, 16  ;;  %v705_v50 = vand.u32 65535, %v704_v4 }
 0x114   : > { %v708_v7 = vcvt.s32.f32 %v706_v5  ;;  %v707_v52 = vcvt.s32.f32 %v705_v50 }
 0x116   : > { %709 = vmin.xlane.f32.xlu2 %v708_v7  ;;  %v689_v24 = vpop.xlane.xlu2 %688 }
 0x117   : > { %vm697_vm13 = vcmp.eq.f32.partialorder %v681_v58, %v689_v24 }
 0x118   : > { %v701_v31 = vsel %vm697_vm13, %v1062_v22, 32 }
 0x119   : > { %v487_v10 = vpop.f32.mrf.mxu1  ;;  %v1112_v34 = vsel %vm471_vm9, %v701_v31, 2147483647 }
 0x11a   : > { %v1092_v11 = vadd.f32 %v958_v8, %v487_v10  ;;  %v721_v38 = vshra.s32 %v1112_v34, 16  ;;  %v720_v18 = vand.u32 65535, %v1112_v34 }
 0x11c   : > { %v497_v13 = vmul.f32 %v1092_v11, %v1092_v11  ;;  %v1120_v45 = vcvt.s32.f32 %v721_v38 }
 0x11e   : > { %v501_v14 = vsel %vm420_vm2, %v497_v13, 0.0 }
 0x11f   : > { %502 = vadd.xlane.f32.xlu0 %v501_v14 }
 0x121   : > { %v489_v16 = vpop.f32.mrf.mxu1 }
 0x122   : > { %v1097_v17 = vadd.f32 %v958_v8, %v489_v16 }
 0x124   : > { %v498_v20 = vmul.f32 %v1097_v17, %v1097_v17 }
 0x126   : > { %v504_v26 = vsel %vm420_vm2, %v498_v20, 0.0 }
 0x127   : > { %505 = vadd.xlane.f32.xlu0 %v504_v26  ;;  %v722_v26 = vcvt.s32.f32 %v720_v18 }
 0x129   : > { %v492_v28 = vpop.f32.mrf.mxu1 }
 0x12a   : > { %v1105_v30 = vadd.f32 %v958_v8, %v492_v28 }
 0x12c   : > { %v499_v32 = vmul.f32 %v1105_v30, %v1105_v30 }
 0x12e   : > { %v507_v35 = vsel %vm420_vm2, %v499_v32, 0.0 }
 0x12f   : > { %508 = vadd.xlane.f32.xlu1 %v507_v35  ;;  %691 = vmax.xlane.f32.xlu0 %v690_v23 }
 0x131   : > { %v494_v37 = vpop.f32.mrf.mxu1 }
 0x132   : > { %v1116_v39 = vadd.f32 %v958_v8, %v494_v37 }
 0x134   : > { %v500_v42 = vmul.f32 %v1116_v39, %v1116_v39 }
 0x136   : > { %v510_v46 = vsel %vm420_vm2, %v500_v42, 0.0 }
 0x137   : > { %511 = vadd.xlane.f32.xlu1 %v510_v46  ;;  %724 = vmin.xlane.f32.xlu0 %v1120_v45 }
 0x13f   : > { %694 = vmax.xlane.f32.xlu1 %v693_v49 }
 0x189   : > { %v1131_v51 = vpop.xlane.xlu2 %709 }
 0x18a   : > { %vm711_vm15 = vcmp.eq.f32.partialorder %v708_v7, %v1131_v51 }
 0x18b   : > { %v712_v53 = vsel %vm711_vm15, %v707_v52, inf }
 0x18c   : > { %713 = vmin.xlane.f32.xlu0 %v712_v53 }
 0x192   : > { %v503_v54 = vpop.xlane.xlu0 %502 }
 0x193   : > { %v513_v55 = vmax.f32 %v503_v54, 1e-16 }
 0x195   : > { %961 = vrsqrt.f32 %v513_v55  ;;  %vm523_vm3 = vweird.f32 %v513_v55 }
 0x19a   : > { %v506_v56 = vpop.xlane.xlu0 %505 }
 0x19b   : > { %v962_v57 = vpop.eup %961  ;;  %v514_v58 = vmax.f32 %v506_v56, 1e-16 }
 0x19c   : > { %v518_v59 = vmul.f32 %v962_v57, %v513_v55  ;;  %vm524_vm0 = vweird.f32 %v962_v57 }
 0x19d   : > { %963 = vrsqrt.f32 %v514_v58  ;;  %vm525_vm5 = vmor %vm523_vm3, %vm524_vm0  ;;  %vm533_vm6 = vweird.f32 %v514_v58 }
 0x19e   : > { %v519_v60 = vmul.f32 %v962_v57, %v518_v59 }
 0x1a0   : > { %v520_v61 = vmul.f32 0.5, %v519_v60 }
 0x1a2   : > { %v509_v62 = vpop.xlane.xlu1 %508  ;;  %v692_v63 = vpop.xlane.xlu0 %691  ;;  %v521_v2 = vsub.f32 1.5, %v520_v61 }
 0x1a3   : > { %v964_v0 = vpop.eup %963  ;;  %v515_v1 = vmax.f32 %v509_v62, 1e-16  ;;  %vm698_vm1 = vcmp.eq.f32.partialorder %v682_v29, %v692_v63 }
 0x1a4   : > { %v528_v3 = vmul.f32 %v964_v0, %v514_v58  ;;  %v702_v4 = vsel %vm698_vm1, %v1062_v22, 32  ;;  %v522_v8 = vmul.f32 %v962_v57, %v521_v2  ;;  %vm534_vm4 = vweird.f32 %v964_v0 }
 0x1a5   : > { %965 = vrsqrt.f32 %v515_v1  ;;  %v1143_v5 = vsel %vm471_vm9, %v702_v4, 2147483647  ;;  %vm535_vm7 = vmor %vm533_vm6, %vm534_vm4  ;;  %vm543_vm12 = vweird.f32 %v515_v1 }
 0x1a6   : > { %v529_v6 = vmul.f32 %v964_v0, %v528_v3  ;;  %v736_v7 = vshra.s32 %v1143_v5, 16  ;;  %v526_v21 = vsel %vm525_vm5, %v962_v57, %v522_v8  ;;  %v735_v52 = vand.u32 65535, %v1143_v5 }
 0x1a7   : > { %v557_v27 = vmul.f32 %v526_v21, %v1092_v11 }
 0x1a8   : > { %v530_v9 = vmul.f32 0.5, %v529_v6  ;;  %v738_v10 = vcvt.s32.f32 %v736_v7  ;;  %v737_v43 = vcvt.s32.f32 %v735_v52 }
 0x1aa   : > { %v531_v12 = vsub.f32 1.5, %v530_v9  ;;  %v512_v13 = vpop.xlane.xlu1 %511  ;;  %739 = vmin.xlane.f32.xlu1 %v738_v10  ;;  %v1146_v16 = vpop.xlane.xlu0 %724 }
 0x1ab   : > { %v966_v14 = vpop.eup %965  ;;  %v516_v15 = vmax.f32 %v512_v13, 1e-16  ;;  %vm726_vm8 = vcmp.eq.f32.partialorder %v1120_v45, %v1146_v16  ;;  %v731_v9 = vcvt.f32.s32 %v1146_v16 }
 0x1ac   : > { %v532_v19 = vmul.f32 %v964_v0, %v531_v12  ;;  %v538_v20 = vmul.f32 %v966_v14, %v515_v1  ;;  %v727_v31 = vsel %vm726_vm8, %v722_v26, inf  ;;  %vm544_vm11 = vweird.f32 %v966_v14 }
 0x1ad   : > { %967 = vrsqrt.f32 %v516_v15  ;;  %vm545_vm14 = vmor %vm543_vm12, %vm544_vm11  ;;  %vm553_vm15 = vweird.f32 %v516_v15  ;;  %v716_v12 = vcvt.f32.s32 %v1131_v51  ;;  %v979_v51 = vmov 0.0  }
 0x1ae   : > { %v539_v24 = vmul.f32 %v966_v14, %v538_v20  ;;  %v536_v25 = vsel %vm535_vm7, %v964_v0, %v532_v19 }
 0x1af   : > { %v558_v28 = vmul.f32 %v536_v25, %v1097_v17  ;;  %v717_v20 = vshll.u32 %v716_v12, 16 }
 0x1b0   : > { %v540_v29 = vmul.f32 0.5, %v539_v24 }
 0x1b1   : > { %v561_v32 = vpack.c.bf16 %v558_v28, %v557_v27 }
 0x1b2   : > { %728 = vmin.xlane.f32.xlu1 %v727_v31  ;;  %v695_v23 = vpop.xlane.xlu1 %694  ;;  %v541_v34 = vsub.f32 1.5, %v540_v29 }
 0x1b3   : > { %v968_v33 = vpop.eup %967  ;;  %vm699_vm10 = vcmp.eq.f32.partialorder %v1126_v48, %v695_v23  ;;  %930 = vmatmul.msk.bf16.vlgmr.msra.gmra.mxu3 %vm420_vm2, %v561_v32 }
 0x1b4   : > { %v548_v35 = vmul.f32 %v968_v33, %v516_v15  ;;  %v703_v36 = vsel %vm699_vm10, %v1062_v22, 32  ;;  %v542_v41 = vmul.f32 %v966_v14, %v541_v34  ;;  %vm554_vm13 = vweird.f32 %v968_v33 }
 0x1b5   : > { %v749_v37 = vsel %vm471_vm9, %v703_v36, 2147483647  ;;  %vm555_vm1 = vmor %vm553_vm15, %vm554_vm13 }
 0x1b6   : > { %v549_v38 = vmul.f32 %v968_v33, %v548_v35  ;;  %v751_v11 = vshra.s32 %v749_v37, 16  ;;  %v546_v46 = vsel %vm545_vm14, %v966_v14, %v542_v41  ;;  %v750_v55 = vand.u32 65535, %v749_v37 }
 0x1b7   : > { %v559_v48 = vmul.f32 %v546_v46, %v1105_v30  ;;  %v584_v30 = vunpack.c.l.bf16 %v1137_v40  ;;  %v732_v14 = vshll.u32 %v731_v9, 16 }
 0x1b8   : > { %v550_v17 = vmul.f32 0.5, %v549_v38  ;;  %v753_v42 = vcvt.s32.f32 %v751_v11  ;;  %v752_v57 = vcvt.s32.f32 %v750_v55 }
 0x1ba   : > { %v551_v44 = vsub.f32 1.5, %v550_v17  ;;  %754 = vmin.xlane.f32.xlu2 %v753_v42 }
 0x1bc   : > { %v552_v45 = vmul.f32 %v968_v33, %v551_v44 }
 0x1be   : > { %v556_v47 = vsel %vm555_vm1, %v968_v33, %v552_v45 }
 0x1bf   : > { %v560_v49 = vmul.f32 %v556_v47, %v1116_v39  ;;  %v585_v39 = vmul.f32 %v584_v30, %v584_v30 }
 0x1c1   : > { %v562_v50 = vpack.c.bf16 %v560_v49, %v559_v48  ;;  %v586_v59 = vsel %vm471_vm9, %v585_v39, 0.0 }
 0x1c2   : > { %v587_v60 = vrot.slane %v586_v59, 4 }
 0x1c3   : > { %931 = vmatmul.msk.bf16.gmra.mxu3 %vm420_vm2, %v562_v50 }
 0x1c4   : > { %v588_v61 = vadd.f32 %v587_v60, %v586_v59 }
 0x1c6   : > { %v589_v62 = vrot.slane %v588_v61, 2 }
 0x1c8   : > { %v590_v63 = vadd.f32 %v589_v62, %v588_v61 }
 0x1ca   : > { %v591_v0 = vrot.slane %v590_v63, 1 }
 0x1cc   : > { %v592_v1 = vadd.f32 %v591_v0, %v590_v63 }
 0x1ce   : > { %v593_v2 = vmax.f32 %v592_v1, 1e-16 }
 0x1d0   : > { %969 = vrsqrt.f32 %v593_v2  ;;  %vm600_vm2 = vweird.f32 %v593_v2 }
 0x1d6   : > { %v970_v3 = vpop.eup %969 }
 0x1d7   : > { %v595_v4 = vmul.f32 %v970_v3, %v593_v2  ;;  %vm601_vm4 = vweird.f32 %v970_v3 }
 0x1d8   : > { %vm602_vm5 = vmor %vm600_vm2, %vm601_vm4 }
 0x1d9   : > { %v596_v5 = vmul.f32 %v970_v3, %v595_v4 }
 0x1db   : > { %v597_v7 = vmul.f32 0.5, %v596_v5 }
 0x1ff   : > { %v714_v40 = vpop.xlane.xlu0 %713 }
 0x200   : > { %v715_v15 = vcvt.f32.s32 %v714_v40 }
 0x202   : > { %v718_v24 = vadd.s32 %v717_v20, %v715_v15 }
 0x204   : > { %vm764_vm7 = vcmp.eq.s32.totalorder %v1062_v22, %v718_v24 }
 0x205   : > { %v932_v33 = vsel %vm764_vm7, 1.0, %v979_v51 }
 0x21d   : > { %v740_v53 = vpop.xlane.xlu1 %739 }
 0x21e   : > { %vm741_vm0 = vcmp.eq.f32.partialorder %v738_v10, %v740_v53  ;;  %v598_v10 = vsub.f32 1.5, %v597_v7  ;;  %v746_v26 = vcvt.f32.s32 %v740_v53 }
 0x21f   : > { %v742_v54 = vsel %vm741_vm0, %v737_v43, inf }
 0x220   : > { %743 = vmin.xlane.f32.xlu2 %v742_v54  ;;  %v599_v18 = vmul.f32 %v970_v3, %v598_v10  ;;  %v747_v31 = vshll.u32 %v746_v26, 16 }
 0x222   : > { %v603_v25 = vsel %vm602_vm5, %v970_v3, %v599_v18 }
 0x225   : > { %v729_v8 = vpop.xlane.xlu1 %728 }
 0x226   : > { %v730_v13 = vcvt.f32.s32 %v729_v8 }
 0x228   : > { %v733_v21 = vadd.s32 %v732_v14, %v730_v13 }
 0x22a   : > { %vm765_vm6 = vcmp.eq.s32.totalorder %v1062_v22, %v733_v21 }
 0x22b   : > { %v933_v28 = vsel %vm765_vm6, 1.0, %v979_v51 }
 0x22d   : > { %v1161_v56 = vpop.xlane.xlu2 %754 }
 0x22e   : > { %vm756_vm3 = vcmp.eq.f32.partialorder %v753_v42, %v1161_v56  ;;  %v761_v46 = vcvt.f32.s32 %v1161_v56 }
 0x22f   : > { %v757_v58 = vsel %vm756_vm3, %v752_v57, inf }
 0x230   : > { %758 = vmin.xlane.f32.xlu0 %v757_v58  ;;  %v762_v48 = vshll.u32 %v761_v46, 16 }
 0x236   : > { %v666_v6 = vpop.f32.mrf.mxu3 }
 0x237   : > { %v676_v16 = vmul.f32 %v666_v6, %v603_v25 }
 0x239   : > { %v776_v35 = vmul.f32 %v932_v33, %v676_v16 }
 0x23b   : > { %v780_v41 = vsel %vm471_vm9, %v776_v35, 0.0 }
 0x23e   : > { %v668_v19 = vpop.f32.mrf.mxu3 }
 0x23f   : > { %v677_v27 = vmul.f32 %v668_v19, %v603_v25 }
 0x241   : > { %v777_v32 = vmul.f32 %v933_v28, %v677_v27 }
 0x243   : > { %v781_v37 = vsel %vm471_vm9, %v777_v32, 0.0 }
 0x244   : > { %v782_v42 = vadd.f32 %v781_v37, %v780_v41 }
 0x246   : > { %v671_v34 = vpop.f32.mrf.mxu3 }
 0x247   : > { %v678_v38 = vmul.f32 %v671_v34, %v603_v25 }
 0x24e   : > { %v673_v50 = vpop.f32.mrf.mxu3 }
 0x24f   : > { %v679_v53 = vmul.f32 %v673_v50, %v603_v25 }
 0x293   : > { %v744_v29 = vpop.xlane.xlu2 %743 }
 0x294   : > { %v745_v23 = vcvt.f32.s32 %v744_v29 }
 0x296   : > { %v748_v36 = vadd.s32 %v747_v31, %v745_v23 }
 0x298   : > { %vm766_vm8 = vcmp.eq.s32.totalorder %v1062_v22, %v748_v36 }
 0x299   : > { %v934_v11 = vsel %vm766_vm8, 1.0, %v979_v51 }
 0x29a   : > { %v778_v17 = vmul.f32 %v934_v11, %v678_v38 }
 0x29c   : > { %v783_v44 = vsel %vm471_vm9, %v778_v17, 0.0 }
 0x29d   : > { %v784_v45 = vadd.f32 %v783_v44, %v782_v42 }
 0x2a3   : > { %v759_v47 = vpop.xlane.xlu0 %758 }
 0x2a4   : > { %v760_v49 = vcvt.f32.s32 %v759_v47 }
 0x2a6   : > { %v763_v52 = vadd.s32 %v762_v48, %v760_v49 }
 0x2a8   : > { %vm767_vm10 = vcmp.eq.s32.totalorder %v1062_v22, %v763_v52 }
 0x2a9   : > { %v935_v43 = vsel %vm767_vm10, 1.0, %v979_v51 }
 0x2aa   : > { %v779_v54 = vmul.f32 %v935_v43, %v679_v53 }
 0x2ac   : > { %v785_v55 = vsel %vm471_vm9, %v779_v54, 0.0 }
 0x2ad   : > { %v786_v57 = vadd.f32 %v785_v55, %v784_v45 }
 0x2af   : > { %787 = vadd.xlane.f32.xlu1 %v786_v57 }
 0x322   : > { %v788_v58 = vpop.xlane.xlu1 %787 }
 0x323   : > { %v789_v30 = vrot.slane %v788_v58, 4 }
 0x325   : > { %v790_v39 = vadd.f32 %v789_v30, %v788_v58 }
 0x327   : > { %v791_v59 = vrot.slane %v790_v39, 2 }
 0x329   : > { %v792_v56 = vadd.f32 %v791_v59, %v790_v39 }
 0x32b   : > { %v793_v60 = vrot.slane %v792_v56, 1 }
 0x32d   : > { %v794_v61 = vadd.f32 %v793_v60, %v792_v56 }
 0x32f   : > { %946 = vpush %v794_v61 }
 0x360   : > { %s947_s16 = spop %946 }
 0x361   : > { %v797_v22 = vstv %s947_s16 }
 0x362   : > { %798 = vst [vmem:[%s357_s15] sm:$0xff] %v797_v22 }
 0x363 PF: > { %s18_s27 = sadd.s32 1, %s977_s27  }
 0x364   : > { %p15_p4 = scmp.ge.s32.totalorder %s18_s27, 4  }
 0x366   :  { %17 = sbr.rel (!%p15_p4) target bundleno = 1 (0x1), region = 91 }

</bundles_post_ra>
